<compile_context>
chip_gen: v7x
topology: tpu7x:2x2x1
jax: 0.10.0
libtpu: 0.0.40
codegen_flags: <defaults>
</compile_context>

<pallas_src>
import jax
import jax.numpy as jnp
from jax.experimental import pallas as pl
from jax.experimental.pallas import tpu as pltpu


# ----------------------------- small helpers --------------------------------

def _sublane_quantum(itemsize):
    # f32 -> 8 sublanes, bf16 -> 16, int8/fp8 -> 32 (packed rows).
    return max(8, 32 // itemsize)


def _padded_tile_bytes(rows, cols, itemsize):
    """VMEM footprint of a (rows, cols) tile after (sublane, lane) padding."""
    q = _sublane_quantum(itemsize)
    r = pl.cdiv(rows, q) * q
    c = pl.cdiv(cols, 128) * 128
    return r * c * itemsize


def _vmem_capacity_bytes():
    """Per-core VMEM capacity; conservative 64 MiB fallback if unqueryable."""
    try:
        cap = int(pltpu.get_tpu_info().vmem_capacity_bytes)
        if cap > 0:
            return cap, True
    except Exception:
        pass
    return 64 * 1024 * 1024, False


# ------------------------------- kernels ------------------------------------

def _attention_vector(gap, w1t_ref, b1_ref, w2f_ref, b2_ref):
    """gap: (C, 1) f32 -> channel attention vector (C, 1) f32 (VPU/XLU only)."""
    # FC1 (+ folded BN1): column-scaled weights, sublane reduce -> (1, mid).
    y1 = jnp.sum(w1t_ref[...] * gap, axis=0, keepdims=True) + b1_ref[...]
    # Hardswish: x * relu6(x + 3) / 6
    y1 = y1 * jnp.clip(y1 + 3.0, 0.0, 6.0) * (1.0 / 6.0)
    # FC2 (+ folded BN2): row-scaled weights, lane reduce -> (C, 1).
    y2 = jnp.sum(w2f_ref[...] * y1, axis=-1, keepdims=True) + b2_ref[...]
    # Hardsigmoid: clip(x / 6 + 1/2, 0, 1)
    return jnp.clip(y2 * (1.0 / 6.0) + 0.5, 0.0, 1.0)


def _make_resident_kernel(hw_inv):
    """Single-pass kernel: whole (C, HW) slab of one batch element resident."""
    def kernel(x_ref, w1t_ref, b1_ref, w2f_ref, b2_ref, o_ref):
        # GAP accumulated in f32 WITHOUT materializing an f32 copy of the tile.
        gap = jnp.sum(x_ref[0], axis=-1, keepdims=True,
                      dtype=jnp.float32) * hw_inv                   # (C, 1)
        y2 = _attention_vector(gap, w1t_ref, b1_ref, w2f_ref, b2_ref)
        # Write straight from the pipelined input buffer, in native dtype.
        o_ref[0] = x_ref[0] * y2.astype(o_ref.dtype)
    return kernel


def _make_gap_kernel(hw_inv):
    """Split-path pass 1: per-(batch, C-tile) global average pool -> (Ct, 1)."""
    def kernel(x_ref, gap_ref):
        gap_ref[0] = jnp.sum(x_ref[0], axis=-1, keepdims=True,
                             dtype=jnp.float32) * hw_inv
    return kernel


def _scale_kernel(x_ref, y_ref, o_ref):
    """Split-path pass 2: out = x * y2 (lane-broadcast over the full HW)."""
    o_ref[0] = x_ref[0] * y_ref[0].astype(o_ref.dtype)


# ------------------------------- wrapper -------------------------------------

def ca_layer_pallas(x, w1, bn1, w2, bn2, eps=1e-5,
                    vmem_budget_bytes=None, force_split=False):
    """x: (N, C, H, W).  w1: (C//r, C), w2: (C, C//r).
    bn1 / bn2: dicts of gamma/beta/mean/var with shapes (C//r,) and (C,)."""
    N, C, H, W = x.shape
    mid = w1.shape[0]
    HW = H * W

    # --- parameter glue (not hot path): fold eval-mode BN into the weights ---
    s1 = bn1["gamma"] * jax.lax.rsqrt(bn1["var"] + eps)              # (mid,)
    b1 = (bn1["beta"] - bn1["mean"] * s1).reshape(1, mid).astype(jnp.float32)
    s2 = bn2["gamma"] * jax.lax.rsqrt(bn2["var"] + eps)              # (C,)
    b2 = (bn2["beta"] - bn2["mean"] * s2).reshape(C, 1).astype(jnp.float32)
    # w1t[c, m] = s1[m] * w1[m, c]  (transposed -> both matvecs are VPU reduces)
    w1t = (w1.astype(jnp.float32) * s1[:, None]).T                   # (C, mid)
    # w2f[c, m] = s2[c] * w2[c, m]
    w2f = w2.astype(jnp.float32) * s2[:, None]                       # (C, mid)

    x_flat = x.reshape(N, C, HW)
    elt = x.dtype.itemsize
    q = _sublane_quantum(elt)

    # --- generation-aware VMEM budget (v7x: 64 MiB/TC, v5e/v6e: 128 MiB) ----
    capacity, cap_known = _vmem_capacity_bytes()
    if vmem_budget_bytes is None:
        vmem_budget_bytes = int(capacity * 0.70)
    vmem_budget_bytes = min(int(vmem_budget_bytes), int(capacity * 0.85))
    headroom = 4 << 20

    def clamp_limit(nbytes):
        # Request a limit with headroom, but never at/above physical capacity.
        return int(min(max(nbytes + headroom, 16 << 20), capacity - (2 << 20)))

    # Padding-aware footprints (double-buffered).
    param_bytes = 2 * (2 * _padded_tile_bytes(C, mid, 4)
                       + _padded_tile_bytes(1, mid, 4)
                       + _padded_tile_bytes(C, 1, 4))
    slab = _padded_tile_bytes(C, HW, elt)          # one (C, HW) block in VMEM
    resident_bytes = 4 * slab + param_bytes        # 2x in + 2x out + params

    # v7x has 2 TensorCores/chip: a grid of one batch element leaves one TC
    # idle.  Prefer the C-tiled split path when N == 1 on ~64 MiB parts.
    two_tc_like = cap_known and capacity <= (96 << 20)
    prefer_split = two_tc_like and N < 2 and C >= 2 * q

    full = lambda arr: pl.BlockSpec(arr.shape, lambda *_: (0,) * arr.ndim)

    if (not force_split and not prefer_split
            and resident_bytes <= vmem_budget_bytes):
        # ------ single-pass path: one HBM read + one HBM write of x ------
        out = pl.pallas_call(
            _make_resident_kernel(1.0 / HW),
            out_shape=jax.ShapeDtypeStruct((N, C, HW), x.dtype),
            grid=(N,),
            in_specs=[
                pl.BlockSpec((1, C, HW), lambda b: (b, 0, 0)),
                full(w1t), full(b1), full(w2f), full(b2),
            ],
            out_specs=pl.BlockSpec((1, C, HW), lambda b: (b, 0, 0)),
            compiler_params=pltpu.CompilerParams(
                dimension_semantics=("parallel",),
                vmem_limit_bytes=clamp_limit(resident_bytes),
            ),
        )(x_flat, w1t, b1, w2f, b2)
        return out.reshape(N, C, H, W)

    # ---- split path: tile over C with the FULL HW on lanes (no padding) ----
    HW_lanes = pl.cdiv(HW, 128) * 128              # layout padding, lanes
    row_bytes = HW_lanes * elt
    ct_cap = C
    if prefer_split:
        # Guarantee >= 2 parallel C-tiles per batch element (2 TensorCores).
        ct_cap = max(q, ((C // 2) // q) * q)

    def pick_ct(buf_factor):
        ct = int(vmem_budget_bytes // (buf_factor * row_bytes))
        ct = max(q, (ct // q) * q)
        ct = min(ct, ct_cap)
        return C if ct >= C else ct

    ct1 = pick_ct(2)   # pass 1: only the input slab is double-buffered
    ct2 = pick_ct(4)   # pass 2: input + output slabs double-buffered

    # Pass 1: GAP only -> gap : (N, C, 1) f32.  Fully parallel grid.
    gap = pl.pallas_call(
        _make_gap_kernel(1.0 / HW),
        out_shape=jax.ShapeDtypeStruct((N, C, 1), jnp.float32),
        grid=(N, pl.cdiv(C, ct1)),
        in_specs=[pl.BlockSpec((1, ct1, HW), lambda b, c: (b, c, 0))],
        out_specs=pl.BlockSpec((1, ct1, 1), lambda b, c: (b, c, 0)),
        compiler_params=pltpu.CompilerParams(
            dimension_semantics=("parallel", "parallel"),
            vmem_limit_bytes=clamp_limit(2 * ct1 * row_bytes),
        ),
    )(x_flat)

    # Tiny per-channel attention math (N x C elements): plain JAX between calls.
    g = gap[..., 0].astype(jnp.float32)                              # (N, C)
    y1 = g @ w1t + b1                                                # (N, mid)
    y1 = y1 * jnp.clip(y1 + 3.0, 0.0, 6.0) * (1.0 / 6.0)             # hardswish
    y2 = y1 @ w2f.T + b2[:, 0][None, :]                              # (N, C)
    y2 = jnp.clip(y2 * (1.0 / 6.0) + 0.5, 0.0, 1.0)[..., None]       # (N, C, 1)

    # Pass 2: out = x * y2, fully parallel over (batch, C tiles).
    out = pl.pallas_call(
        _scale_kernel,
        out_shape=jax.ShapeDtypeStruct((N, C, HW), x.dtype),
        grid=(N, pl.cdiv(C, ct2)),
        in_specs=[
            pl.BlockSpec((1, ct2, HW), lambda b, c: (b, c, 0)),
            pl.BlockSpec((1, ct2, 1), lambda b, c: (b, c, 0)),
        ],
        out_specs=pl.BlockSpec((1, ct2, HW), lambda b, c: (b, c, 0)),
        compiler_params=pltpu.CompilerParams(
            dimension_semantics=("parallel", "parallel"),
            vmem_limit_bytes=clamp_limit(4 * ct2 * row_bytes),
        ),
    )(x_flat, y2)

    return out.reshape(N, C, H, W)


def ca_layer_ref(x, w1, bn1, w2, bn2, eps=1e-5):
    """Pure-JAX (f32) reference for correctness checking."""
    x = x.astype(jnp.float32)
    gap = jnp.mean(x, axis=(2, 3))                                   # (N, C)
    y = gap @ w1.T                                                   # (N, mid)
    y = (y - bn1["mean"]) * jax.lax.rsqrt(bn1["var"] + eps) * bn1["gamma"] + bn1["beta"]
    y = y * jnp.clip(y + 3.0, 0.0, 6.0) / 6.0                        # hardswish
    y = y @ w2.T                                                     # (N, C)
    y = (y - bn2["mean"]) * jax.lax.rsqrt(bn2["var"] + eps) * bn2["gamma"] + bn2["beta"]
    y = jnp.clip(y / 6.0 + 0.5, 0.0, 1.0)                            # hardsigmoid
    return x * y[:, :, None, None]


if __name__ == "__main__":
    # Small shapes consistent with the module (channel >= reduction).
    N, C, H, W = 2, 32, 16, 16
    reduction = 16
    mid = C // reduction  # 2

    key = jax.random.PRNGKey(0)
    keys = jax.random.split(key, 9)

    x = jax.random.normal(keys[0], (N, C, H, W), dtype=jnp.float32)
    w1 = jax.random.normal(keys[1], (mid, C), dtype=jnp.float32) * (1.0 / jnp.sqrt(C))
    w2 = jax.random.normal(keys[2], (C, mid), dtype=jnp.float32) * (1.0 / jnp.sqrt(mid))
    bn1 = dict(
        gamma=1.0 + 0.1 * jax.random.normal(keys[3], (mid,), dtype=jnp.float32),
        beta=0.1 * jax.random.normal(keys[4], (mid,), dtype=jnp.float32),
        mean=0.05 * jax.random.normal(keys[5], (mid,), dtype=jnp.float32),
        var=jnp.abs(jax.random.normal(keys[6], (mid,), dtype=jnp.float32)) + 0.5,
    )
    bn2 = dict(
        gamma=1.0 + 0.1 * jax.random.normal(keys[7], (C,), dtype=jnp.float32),
        beta=0.1 * jax.random.normal(keys[8], (C,), dtype=jnp.float32),
        mean=jnp.zeros((C,), dtype=jnp.float32),
        var=jnp.ones((C,), dtype=jnp.float32),
    )

    ref = ca_layer_ref(x, w1, bn1, w2, bn2)

    # 1) Default path (resident on v5e/v6e/v7x at this size), f32.
    out = jax.block_until_ready(ca_layer_pallas(x, w1, bn1, w2, bn2))
    assert out.shape == x.shape and out.dtype == x.dtype
    assert jnp.allclose(out, ref, atol=2e-5, rtol=2e-5), "default path mismatch"

    # 2) Forced split path, default budget (single C tile per batch element).
    out_split = jax.block_until_ready(
        ca_layer_pallas(x, w1, bn1, w2, bn2, force_split=True))
    assert out_split.shape == x.shape and out_split.dtype == x.dtype
    assert jnp.allclose(out_split, ref, atol=2e-5, rtol=2e-5), "split path mismatch"

    # 3) Forced split path with a tiny budget so C is actually tiled (ct < C).
    out_tiled = jax.block_until_ready(
        ca_layer_pallas(x, w1, bn1, w2, bn2, force_split=True,
                        vmem_budget_bytes=1))
    assert jnp.allclose(out_tiled, ref, atol=2e-5, rtol=2e-5), \
        "C-tiled split path mismatch"

    # 4) bf16 at the HBM boundary (native-dtype load/store, f32 attention math).
    out_bf16 = jax.block_until_ready(
        ca_layer_pallas(x.astype(jnp.bfloat16), w1, bn1, w2, bn2))
    assert out_bf16.dtype == jnp.bfloat16
    assert jnp.allclose(out_bf16.astype(jnp.float32), ref, atol=5e-2, rtol=5e-2), \
        "bf16 path mismatch"

    # 5) N=1 (exercises the 2-TensorCore heuristic on v7x-like parts; resident
    #    elsewhere — both paths are checked above for correctness).
    out_n1 = jax.block_until_ready(
        ca_layer_pallas(x[:1], w1, bn1, w2, bn2))
    assert jnp.allclose(out_n1, ref[:1], atol=2e-5, rtol=2e-5), "N=1 path mismatch"

    print("KERNEL_OK")
</pallas_src>

<mosaic_0001>
module attributes {stable_mosaic.version = 11 : i64} {
  func.func @kernel(%arg0: i32, %arg1: memref<1x32x256xf32, #tpu.memory_space<vmem>>, %arg2: memref<32x2xf32, #tpu.memory_space<vmem>>, %arg3: memref<1x2xf32, #tpu.memory_space<vmem>>, %arg4: memref<32x2xf32, #tpu.memory_space<vmem>>, %arg5: memref<32x1xf32, #tpu.memory_space<vmem>>, %arg6: memref<1x32x256xf32, #tpu.memory_space<vmem>>) attributes {dimension_semantics = [#tpu.dimension_semantics<parallel>], iteration_bounds = array<i64: 2>, scalar_prefetch = 0 : i64, scratch_operands = 0 : i64, tpu.core_type = #tpu.core_type<tc>, window_params = [{transform_indices = @transform_0, window_bounds = array<i64: 1, 32, 256>}, {pipeline_mode = #tpu.pipeline_mode<synchronous>, transform_indices = @transform_1, window_bounds = array<i64: 32, 2>}, {pipeline_mode = #tpu.pipeline_mode<synchronous>, transform_indices = @transform_2, window_bounds = array<i64: 1, 2>}, {pipeline_mode = #tpu.pipeline_mode<synchronous>, transform_indices = @transform_3, window_bounds = array<i64: 32, 2>}, {pipeline_mode = #tpu.pipeline_mode<synchronous>, transform_indices = @transform_4, window_bounds = array<i64: 32, 1>}, {transform_indices = @transform_5, window_bounds = array<i64: 1, 32, 256>}]} {
    %c0 = arith.constant 0 : index
    %c0_0 = arith.constant 0 : index
    %c0_1 = arith.constant 0 : index
    %0 = vector.load %arg1[%c0, %c0_0, %c0_1] : memref<1x32x256xf32, #tpu.memory_space<vmem>>, vector<1x32x256xf32>
    %1 = vector.shape_cast %0 : vector<1x32x256xf32> to vector<32x256xf32>
    %cst = arith.constant dense<0.000000e+00> : vector<32xf32>
    %2 = vector.multi_reduction <add>, %1, %cst [1] : vector<32x256xf32> to vector<32xf32>
    %3 = vector.shape_cast %2 : vector<32xf32> to vector<32x1xf32>
    %cst_2 = arith.constant 3.906250e-03 : f32
    %4 = vector.broadcast %cst_2 : f32 to vector<32x1xf32>
    %5 = arith.mulf %3, %4 : vector<32x1xf32>
    %c0_3 = arith.constant 0 : index
    %c0_4 = arith.constant 0 : index
    %6 = vector.load %arg2[%c0_3, %c0_4] : memref<32x2xf32, #tpu.memory_space<vmem>>, vector<32x2xf32>
    %7 = vector.broadcast %5 : vector<32x1xf32> to vector<32x2xf32>
    %8 = arith.mulf %6, %7 : vector<32x2xf32>
    %cst_5 = arith.constant dense<0.000000e+00> : vector<2xf32>
    %9 = vector.multi_reduction <add>, %8, %cst_5 [0] : vector<32x2xf32> to vector<2xf32>
    %10 = vector.shape_cast %9 : vector<2xf32> to vector<1x2xf32>
    %c0_6 = arith.constant 0 : index
    %c0_7 = arith.constant 0 : index
    %11 = vector.load %arg3[%c0_6, %c0_7] : memref<1x2xf32, #tpu.memory_space<vmem>>, vector<1x2xf32>
    %12 = arith.addf %10, %11 : vector<1x2xf32>
    %cst_8 = arith.constant 3.000000e+00 : f32
    %13 = vector.broadcast %cst_8 : f32 to vector<1x2xf32>
    %14 = arith.addf %12, %13 : vector<1x2xf32>
    %cst_9 = arith.constant 0.000000e+00 : f32
    %cst_10 = arith.constant 6.000000e+00 : f32
    %15 = vector.broadcast %cst_9 : f32 to vector<1x2xf32>
    %16 = arith.maximumf %15, %14 : vector<1x2xf32>
    %17 = vector.broadcast %cst_10 : f32 to vector<1x2xf32>
    %18 = arith.minimumf %17, %16 : vector<1x2xf32>
    %19 = arith.mulf %12, %18 : vector<1x2xf32>
    %cst_11 = arith.constant 0.166666672 : f32
    %20 = vector.broadcast %cst_11 : f32 to vector<1x2xf32>
    %21 = arith.mulf %19, %20 : vector<1x2xf32>
    %c0_12 = arith.constant 0 : index
    %c0_13 = arith.constant 0 : index
    %22 = vector.load %arg4[%c0_12, %c0_13] : memref<32x2xf32, #tpu.memory_space<vmem>>, vector<32x2xf32>
    %23 = vector.broadcast %21 : vector<1x2xf32> to vector<32x2xf32>
    %24 = arith.mulf %22, %23 : vector<32x2xf32>
    %cst_14 = arith.constant dense<0.000000e+00> : vector<32xf32>
    %25 = vector.multi_reduction <add>, %24, %cst_14 [1] : vector<32x2xf32> to vector<32xf32>
    %26 = vector.shape_cast %25 : vector<32xf32> to vector<32x1xf32>
    %c0_15 = arith.constant 0 : index
    %c0_16 = arith.constant 0 : index
    %27 = vector.load %arg5[%c0_15, %c0_16] : memref<32x1xf32, #tpu.memory_space<vmem>>, vector<32x1xf32>
    %28 = arith.addf %26, %27 : vector<32x1xf32>
    %cst_17 = arith.constant 0.166666672 : f32
    %29 = vector.broadcast %cst_17 : f32 to vector<32x1xf32>
    %30 = arith.mulf %28, %29 : vector<32x1xf32>
    %cst_18 = arith.constant 5.000000e-01 : f32
    %31 = vector.broadcast %cst_18 : f32 to vector<32x1xf32>
    %32 = arith.addf %30, %31 : vector<32x1xf32>
    %cst_19 = arith.constant 0.000000e+00 : f32
    %cst_20 = arith.constant 1.000000e+00 : f32
    %33 = vector.broadcast %cst_19 : f32 to vector<32x1xf32>
    %34 = arith.maximumf %33, %32 : vector<32x1xf32>
    %35 = vector.broadcast %cst_20 : f32 to vector<32x1xf32>
    %36 = arith.minimumf %35, %34 : vector<32x1xf32>
    %c0_21 = arith.constant 0 : index
    %c0_22 = arith.constant 0 : index
    %c0_23 = arith.constant 0 : index
    %37 = vector.load %arg1[%c0_21, %c0_22, %c0_23] : memref<1x32x256xf32, #tpu.memory_space<vmem>>, vector<1x32x256xf32>
    %38 = vector.shape_cast %37 : vector<1x32x256xf32> to vector<32x256xf32>
    %39 = vector.broadcast %36 : vector<32x1xf32> to vector<32x256xf32>
    %40 = arith.mulf %38, %39 : vector<32x256xf32>
    %c0_24 = arith.constant 0 : index
    %c0_25 = arith.constant 0 : index
    %c0_26 = arith.constant 0 : index
    %41 = vector.load %arg6[%c0_24, %c0_25, %c0_26] : memref<1x32x256xf32, #tpu.memory_space<vmem>>, vector<1x32x256xf32>
    %42 = vector.shape_cast %41 : vector<1x32x256xf32> to vector<32x256xf32>
    %43 = vector.shape_cast %40 : vector<32x256xf32> to vector<1x32x256xf32>
    tpu.vector_store %arg6[%c0_24, %c0_25, %c0_26], %43 {strides = array<i32>} : memref<1x32x256xf32, #tpu.memory_space<vmem>>, vector<1x32x256xf32>,
    return
  }
  func.func @transform_0(%arg0: i32) -> (i32, i32, i32) {
    %c0_i32 = arith.constant 0 : i32
    %c0_i32_0 = arith.constant 0 : i32
    %c0_i32_1 = arith.constant 0 : i32
    return %arg0, %c0_i32, %c0_i32_0 : i32, i32, i32
  }
  func.func @transform_1(%arg0: i32) -> (i32, i32) {
    %c0_i32 = arith.constant 0 : i32
    %c0_i32_0 = arith.constant 0 : i32
    %c0_i32_1 = arith.constant 0 : i32
    return %c0_i32, %c0_i32_0 : i32, i32
  }
  func.func @transform_2(%arg0: i32) -> (i32, i32) {
    %c0_i32 = arith.constant 0 : i32
    %c0_i32_0 = arith.constant 0 : i32
    %c0_i32_1 = arith.constant 0 : i32
    return %c0_i32, %c0_i32_0 : i32, i32
  }
  func.func @transform_3(%arg0: i32) -> (i32, i32) {
    %c0_i32 = arith.constant 0 : i32
    %c0_i32_0 = arith.constant 0 : i32
    %c0_i32_1 = arith.constant 0 : i32
    return %c0_i32, %c0_i32_0 : i32, i32
  }
  func.func @transform_4(%arg0: i32) -> (i32, i32) {
    %c0_i32 = arith.constant 0 : i32
    %c0_i32_0 = arith.constant 0 : i32
    %c0_i32_1 = arith.constant 0 : i32
    return %c0_i32, %c0_i32_0 : i32, i32
  }
  func.func @transform_5(%arg0: i32) -> (i32, i32, i32) {
    %c0_i32 = arith.constant 0 : i32
    %c0_i32_0 = arith.constant 0 : i32
    %c0_i32_1 = arith.constant 0 : i32
    return %arg0, %c0_i32, %c0_i32_0 : i32, i32, i32
  }
}

</mosaic_0001>

<bundles_post_ra>
// kernel: tpu_custom_call.1
= control target key start
LH: loop header
LB: loop body
LE: loop exit
PB: predicated region body
PF: predicated region fallthrough
CT: control target
= control target key end

     0   :  { %10 = vsyncpa [#allocation3], 0  ;;  %s916_s0 = inlined_call_operand.hbm [shape: f32[2,32,256], index: 0, kind: input, shape index: {}]   ;;  %s917_s1 = inlined_call_operand.vmem [shape: f32[32,2], index: 1, kind: input, shape index: {}]   ;;  %s918_s2 = inlined_call_operand.vmem [shape: f32[1,2], index: 2, kind: input, shape index: {}]   ;;  %s919_s3 = inlined_call_operand.vmem [shape: f32[32,2], index: 3, kind: input, shape index: {}]   ;;  %s920_s4 = inlined_call_operand.vmem [shape: f32[32,1], index: 4, kind: input, shape index: {}]   ;;  %s921_s5 = inlined_call_operand.hbm [shape: f32[2,32,256], index: 5, kind: output, shape index: {}]  }
   0x1   :  { %12 = vsyncpa [#allocation3 + $0x1], 0 }
   0x2   :  { %13 = vsyncpa [#allocation4], 0 }
   0x3   :  { %15 = vsyncpa [#allocation4 + $0x1], 0  ;;  %s671_s18 = smov 0   ;;  %s673_s19 = smov 0  }
   0x4   :  { %s675_s20 = smov 0   ;;  %s677_s21 = smov 0  }
   0x5 LB: > { %s692_s22 = sadd.s32 4294967295, %s632_s21   ;;  %s467_s23 = sadd.s32 4294967294, %s632_s21   ;;  %s632_s21 = sphi %s677_s21, %s934_s21   ;;  %s628_s20 = sphi %s675_s20, %s933_s20   ;;  %s624_s19 = sphi %s673_s19, %s932_s19   ;;  %s620_s18 = sphi %s671_s18, %s931_s18  }
   0x6   : > { %s696_s24 = sadd.s32 1, %s632_s21   ;;  %s28_s25 = sadd.s32 1, %s628_s20 }
   0x7   : > { %s25_s26 = ssub.s32 %s632_s21, %s696_s24  ;;  %p35_p0 = scmp.ne.s32.totalorder %s628_s20, %s624_s19 }
   0x8   : > { %p26_p1 = scmp.eq.s32.totalorder %s25_s26, 0  ;;  %p36_p2 = scmp.eq.s32.totalorder %s632_s21, 0 }
   0x9   : > { %p41_p3 = scmp.ne.s32.totalorder %s624_s19, %s620_s18  ;;  %p42_p4 = scmp.eq.s32.totalorder %s692_s22, 0 }
   0xa   : > { %s708_s27 = scalar_select %p26_p1, %s628_s20, %s28_s25  }
   0xb   : > { %p710_p5 = por %p36_p2, %p35_p0  ;;  %p714_p6 = por %p42_p4, %p41_p3 }
   0xc   : > { %p149_p7 = scmp.eq.s32.totalorder %s692_s22, 1  ;;  %p155_p8 = scmp.eq.s32.totalorder %s467_s23, 1 }
   0xd   : > { %p495_p10 = scmp.lt.s32.totalorder %s632_s21, 2  ;;  %s187_s7 = sand.u32 1, %s628_s20  }
   0xe   : > { %p721_p11 = por %p149_p7, %p35_p0  ;;  %p725_p12 = por %p155_p8, %p41_p3 }
   0xf   : > { %s481_s8 = sshll.u32 %s632_s21, 10  ;;  %s470_s9 = sshll.u32 %s187_s7, 6 }
  0x10   : > { %s925_s30 = scalar_select %p721_p11, 1, 0 }
  0x11   : > { %s926_s6 = scalar_select %p725_p12, 1, 0 }
  0x12   : > { %s734_s12 = scalar_lea.hbm %s916_s0, %s481_s8  ;;  %s191_s13 = scalar_lea.vmem [#allocation2], %s470_s9 }
  0x13   : > { %s198_s14 = sshll.u32 %s191_s13, 4  ;;  %p738_p13 = pnand %p495_p10, %p710_p5  ;;  %s742_s14 = int_to_ptr.vmem [resolvable:$true] %s198_s14 }
  0x14   : > { %s744_s16 = scalar_lea.sflag [#allocation3], %s187_s7  ;;  %s536_s17 = scalar_lea.hbm %s734_s12, 1024 }
  0x15   : > { %p537_p0 = scmp.ne.s32.totalorder %s734_s12, %s536_s17  ;;  %p538_p1 = pneg %p738_p13 }
  0x16   : > { %s541_s26 = scalar_lea.hbm %s916_s0, 2048  ;;  %p542_p4 = scmp.lt.u32.totalorder %s734_s12, %s916_s0 }
  0x17   : > { %p539_p2 = pnand %p538_p1, %p537_p0  ;;  %p543_p5 = scmp.lt.u32.totalorder %s541_s26, %s536_s17 }
  0x18   : > { %p545_p8 = scmp.lt.u32.totalorder %s536_s17, %s734_s12 }
  0x19   : > { %p540_p3 = pneg %p539_p2  ;;  %p544_p7 = por %p543_p5, %p542_p4 }
  0x1b   : > { %p546_p10 = por %p545_p8, %p544_p7 }
  0x1d   : > { %p547_p9 = pnand %p546_p10, %p540_p3 }
  0x1f   : > { %550 = shalt.err (!%p547_p9)
}
  0x20   : > { %s551_s7 = scalar_lea.vmem %s742_s14, 1024  ;;  %s634_s9 = smov [#allocation2]  }
  0x21   : > { %p552_p0 = scmp.ne.s32.totalorder %s742_s14, %s551_s7  ;;  %s556_s10 = sshll.u32 %s634_s9, 4  ;;  %s557_s10 = int_to_ptr.vmem [resolvable:$false] %s556_s10 }
  0x22   : > { %s558_s11 = scalar_lea.vmem %s557_s10, 2048  ;;  %p559_p11 = scmp.lt.s32.totalorder %s742_s14, %s557_s10 }
  0x23   : > { %p554_p2 = pnand %p552_p0, %p538_p1  ;;  %p560_p4 = scmp.lt.s32.totalorder %s558_s11, %s551_s7 }
  0x25   : > { %p555_p12 = pneg %p554_p2  ;;  %p561_p5 = por %p560_p4, %p559_p11 }
  0x27   : > { %p562_p7 = pnand %p561_p5, %p555_p12 }
  0x29   : > { %565 = shalt.err (!%p562_p7)
}
  0x2a   : > { %s635_s13 = smov 256   ;;  %s636_s17 = smov 16  }
  0x2b   : > { %490 = dma.hbm_to_vmem [thread:$0]  (!%p738_p13), %s734_s12, 1024, %s742_s14, %s744_s16, %s635_s13, %s635_s13, %s636_s17  }
  0x2c   : > { %p473_p9 = scmp.ge.s32.totalorder %s632_s21, 1  ;;  %p206_p1 = scmp.lt.s32.totalorder %s632_s21, 3 }
  0x2e   : > { %p207_p3 = pnand %p473_p9, %p206_p1 }
  0x2f   : > { %s775_s23 = sand.u32 (!%p207_p3), 1, %s624_s19  }
  0x30   : > { %210 = sbr.rel (%p207_p3) target bundleno = 550 (0x226), region = 40  ;;  %s474_s25 = sshll.u32 (!%p207_p3), %s775_s23, 6 }
  0x31   : > { %s213_s26 = scalar_lea.sflag (!%p207_p3), [#allocation3], %s775_s23  ;;  %s216_s28 = scalar_lea.vmem (!%p207_p3), [#allocation2], %s474_s25 }
  0x37   : > { %611 = dma.done.wait (%p714_p6), %s213_s26, 1024  }
  0x38   : > { %613 = vsyncadd (%p714_p6), %s213_s26, 4294966272  ;;  %v785_v0 = vld [vmem:[%s216_s28] sm:$0xff]  ;;  %v787_v1 = vld [vmem:[%s216_s28 + $0x8] sm:$0xff]  ;;  %vm275_vm0 = vcmask 15360   ;;  %v300_v43 = vlaneseq  ;;  %s242_s26 = scalar_lea.vmem [#allocation5], %s474_s25  ;;  %s482_s29 = sshll.u32 %s692_s22, 10 }
  0x39   : > { %v789_v2 = vld [vmem:[%s216_s28 + $0x20] sm:$0xff]  ;;  %v251_v3 = vadd.f32 %v787_v1, %v785_v0  ;;  %v793_v4 = vld [vmem:[%s216_s28 + $0x28] sm:$0xff]  ;;  %v795_v5 = vld [vmem:[%s216_s28 + $0x10] sm:$0xff]  ;;  %s870_s14 = scalar_lea.hbm %s921_s5, %s482_s29  ;;  %s381_s22 = scalar_lea.sflag [#allocation4], %s775_s23 }
  0x3a   : > { %v797_v6 = vld [vmem:[%s216_s28 + $0x18] sm:$0xff]  ;;  %v257_v7 = vadd.f32 %v793_v4, %v789_v2  ;;  %v801_v8 = vld [vmem:[%s216_s28 + $0x30] sm:$0xff]  ;;  %v267_v15 = vld [vmem:[%s917_s1] sm:$0xff]  ;;  %v301_v46 = vshrl.u32 %v300_v43, 7  ;;  %p928_p11 = scmp.ne.s32.totalorder %s925_s30, 0  ;;  %s638_s16 = smov [#allocation5]  }
  0x3b   : > { %v803_v9 = vld [vmem:[%s216_s28 + $0x38] sm:$0xff]  ;;  %252 = vadd.xlane.f32.xlu0 %v251_v3  ;;  %v254_v10 = vadd.f32 %v797_v6, %v795_v5  ;;  %v269_v17 = vld [vmem:[%s917_s1 + $0x10] sm:$0xff]  ;;  %v268_v18 = vld [vmem:[%s917_s1 + $0x8] sm:$0xff]  ;;  %v637_v3 = vmov 0   ;;  %s394_s28 = sshll.u32 %s242_s26, 4  ;;  %s570_s8 = sshll.u32 %s638_s16, 4  ;;  %s865_s28 = int_to_ptr.vmem [resolvable:$true] %s394_s28  ;;  %s571_s8 = int_to_ptr.vmem [resolvable:$false] %s570_s8 }
  0x3c   : > { %258 = vadd.xlane.f32.xlu1 %v257_v7  ;;  %v260_v11 = vadd.f32 %v803_v9, %v801_v8  ;;  %v270_v22 = vld [vmem:[%s917_s1 + $0x18] sm:$0xff]  ;;  %v289_v40 = vld [vmem:[%s918_s2] sm:$0x1]  ;;  %v302_v49 = vsub.s32 0, %v301_v46  ;;  %v297_v51 = vld [vmem:[%s919_s3 + $0x8] sm:$0xff]  ;;  %534 = vset.pattern.permute.xlu0 %v637_v3  ;;  %s566_s15 = scalar_lea.vmem %s865_s28, 1024  ;;  %p573_p8 = scmp.lt.s32.totalorder %s865_s28, %s571_s8 }
  0x3d   : > { %v296_v52 = vld [vmem:[%s919_s3] sm:$0xff]  ;;  %v299_v54 = vld [vmem:[%s919_s3 + $0x18] sm:$0xff]  ;;  %v298_v55 = vld [vmem:[%s919_s3 + $0x10] sm:$0xff]  ;;  %535 = vset.pattern.permute.xlu1 %v637_v3  ;;  %p567_p6 = scmp.ne.s32.totalorder %s865_s28, %s566_s15  ;;  %s572_s7 = scalar_lea.vmem %s571_s8, 2048 }
  0x3e   : > { %v321_v7 = vld [vmem:[%s920_s4 + $0x8] sm:$0xff]  ;;  %p574_p10 = scmp.lt.s32.totalorder %s572_s7, %s566_s15 }
  0x3f   : > { %255 = vadd.xlane.f32.xlu0 %v254_v10  ;;  %v320_v10 = vld [vmem:[%s920_s4] sm:$0xff]  ;;  %p568_p12 = pnand %p567_p6, %p928_p11 }
  0x40   : > { %261 = vadd.xlane.f32.xlu1 %v260_v11  ;;  %p575_p0 = por %p574_p10, %p573_p8 }
  0x41   : > { %p569_p13 = pneg %p568_p12 }
  0x43   : > { %p576_p2 = pnand %p575_p0, %p569_p13 }
  0xc8   : > { %v253_v12 = vpop.xlane.xlu0 %252 }
  0xc9   : > { %v263_v13 = vmul.f32 0.00390625, %v253_v12  ;;  %v259_v14 = vpop.xlane.xlu1 %258 }
  0xca   : > { %v265_v16 = vmul.f32 0.00390625, %v259_v14 }
  0xcb   : > { %v271_v20 = vmul.f32 %v267_v15, %v263_v13  ;;  %v323_v15 = vld [vmem:[%s920_s4 + $0x18] sm:$0xff] }
  0xcc   : > { %v256_v19 = vpop.xlane.xlu0 %255  ;;  %v273_v25 = vmul.f32 %v269_v17, %v265_v16  ;;  %v322_v16 = vld [vmem:[%s920_s4 + $0x10] sm:$0xff] }
  0xcd   : > { %v264_v21 = vmul.f32 0.00390625, %v256_v19  ;;  %v262_v23 = vpop.xlane.xlu1 %261  ;;  %v276_v28 = vsel %vm275_vm0, %v271_v20, 0.0 }
  0xce   : > { %v266_v24 = vmul.f32 0.00390625, %v262_v23  ;;  %v279_v31 = vsel %vm275_vm0, %v273_v25, 0.0 }
  0xcf   : > { %v272_v26 = vmul.f32 %v268_v18, %v264_v21 }
  0xd0   : > { %v274_v27 = vmul.f32 %v270_v22, %v266_v24 }
  0xd1   : > { %v277_v29 = vsel %vm275_vm0, %v272_v26, 0.0 }
  0xd2   : > { %v278_v30 = vadd.f32 %v277_v29, %v276_v28  ;;  %v281_v32 = vsel %vm275_vm0, %v274_v27, 0.0 }
  0xd4   : > { %v280_v33 = vadd.f32 %v279_v31, %v278_v30 }
  0xd6   : > { %v282_v34 = vadd.f32 %v281_v32, %v280_v33 }
  0xd8   : > { %v283_v35 = vrot.slane %v282_v34, 4 }
  0xda   : > { %v284_v36 = vadd.f32 %v283_v35, %v282_v34 }
  0xdc   : > { %v285_v37 = vrot.slane %v284_v36, 2 }
  0xde   : > { %v286_v38 = vadd.f32 %v285_v37, %v284_v36 }
  0xe0   : > { %v287_v39 = vrot.slane %v286_v38, 1 }
  0xe2   : > { %v288_v41 = vadd.f32 %v287_v39, %v286_v38 }
  0xe4   : > { %v290_v42 = vadd.f32 %v289_v40, %v288_v41 }
  0xe6   : > { %v291_v44 = vadd.f32 3.0, %v290_v42 }
  0xe8   : > { %v292_v45 = vmax.f32 %v291_v44, 0.0 }
  0xea   : > { %v293_v47 = vmin.f32 %v292_v45, 6.0 }
  0xec   : > { %v294_v48 = vmul.f32 %v293_v47, %v290_v42 }
  0xee   : > { %v295_v50 = vmul.f32 0.16666667, %v294_v48 }
  0xf0   : > { %v303_v53 = vrot.slane %v295_v50, %v302_v49 }
  0xf2   : > { %v305_v56 = vmul.f32 %v303_v53, %v297_v51  ;;  %v304_v57 = vmul.f32 %v303_v53, %v296_v52  ;;  %v307_v60 = vmul.f32 %v303_v53, %v299_v54  ;;  %v306_v61 = vmul.f32 %v303_v53, %v298_v55 }
  0xf4   : > { %v311_v58 = vsel %vm275_vm0, %v305_v56, 0.0  ;;  %v308_v59 = vsel %vm275_vm0, %v304_v57, 0.0  ;;  %v317_v62 = vsel %vm275_vm0, %v307_v60, 0.0  ;;  %v314_v63 = vsel %vm275_vm0, %v306_v61, 0.0 }
  0xf5   : > { %312 = vadd.xlane.f32.xlu1 %v311_v58  ;;  %309 = vadd.xlane.f32.xlu0 %v308_v59 }
  0xf9   : > { %318 = vadd.xlane.f32.xlu1 %v317_v62  ;;  %315 = vadd.xlane.f32.xlu0 %v314_v63 }
 0x182   : > { %v313_v11 = vpop.xlane.xlu1 %312  ;;  %v310_v12 = vpop.xlane.xlu0 %309 }
 0x183   : > { %v325_v13 = vadd.f32 %v321_v7, %v313_v11  ;;  %v324_v14 = vadd.f32 %v320_v10, %v310_v12 }
 0x185   : > { %v329_v17 = vmul.f32 0.16666667, %v325_v13  ;;  %v328_v18 = vmul.f32 0.16666667, %v324_v14 }
 0x186   : > { %v319_v19 = vpop.xlane.xlu1 %318  ;;  %v316_v20 = vpop.xlane.xlu0 %315 }
 0x187   : > { %v333_v21 = vadd.f32 0.5, %v329_v17  ;;  %v332_v22 = vadd.f32 0.5, %v328_v18  ;;  %v327_v23 = vadd.f32 %v323_v15, %v319_v19  ;;  %v326_v24 = vadd.f32 %v322_v16, %v316_v20 }
 0x189   : > { %v337_v25 = vmax.f32 %v333_v21, 0.0  ;;  %v336_v26 = vmax.f32 %v332_v22, 0.0  ;;  %v331_v27 = vmul.f32 0.16666667, %v327_v23  ;;  %v330_v28 = vmul.f32 0.16666667, %v326_v24 }
 0x18b   : > { %v341_v29 = vmin.f32 %v337_v25, 1.0  ;;  %v340_v30 = vmin.f32 %v336_v26, 1.0  ;;  %v335_v31 = vadd.f32 0.5, %v331_v27  ;;  %v334_v32 = vadd.f32 0.5, %v330_v28 }
 0x18d   : > { %v338_v33 = vmax.f32 %v334_v32, 0.0  ;;  %351 = vperm.xlu1 %535, %v341_v29   ;;  %346 = vperm.xlu0 %534, %v340_v30   ;;  %v339_v34 = vmax.f32 %v335_v31, 0.0 }
 0x18f   : > { %v342_v35 = vmin.f32 %v338_v33, 1.0  ;;  %v343_v36 = vmin.f32 %v339_v34, 1.0 }
 0x191   : > { %356 = vperm.xlu1 %535, %v342_v35  }
 0x195   : > { %361 = vperm.xlu1 %535, %v343_v36  }
 0x20c   : > { %v352_v37 = vpop.permute.xlu1 %351  ;;  %v347_v38 = vpop.permute.xlu0 %346 }
 0x20d   : > { %v366_v39 = vmul.f32 %v352_v37, %v795_v5  ;;  %v367_v40 = vmul.f32 %v352_v37, %v797_v6  ;;  %v364_v41 = vmul.f32 %v347_v38, %v785_v0  ;;  %v365_v42 = vmul.f32 %v347_v38, %v787_v1 }
 0x20f   : > { %374 = vst [vmem:[%s242_s26 + $0x10] sm:$0xff] %v366_v39  ;;  %375 = vst [vmem:[%s242_s26 + $0x18] sm:$0xff] %v367_v40 }
 0x210   : > { %372 = vst [vmem:[%s242_s26] sm:$0xff] %v364_v41  ;;  %373 = vst [vmem:[%s242_s26 + $0x8] sm:$0xff] %v365_v42  ;;  %v357_v43 = vpop.permute.xlu1 %356 }
 0x211   : > { %v368_v44 = vmul.f32 %v357_v43, %v789_v2  ;;  %v369_v5 = vmul.f32 %v357_v43, %v793_v4 }
 0x213   : > { %376 = vst [vmem:[%s242_s26 + $0x20] sm:$0xff] %v368_v44  ;;  %377 = vst [vmem:[%s242_s26 + $0x28] sm:$0xff] %v369_v5 }
 0x214   : > { %v362_v0 = vpop.permute.xlu1 %361 }
 0x215   : > { %v370_v1 = vmul.f32 %v362_v0, %v801_v8  ;;  %v371_v2 = vmul.f32 %v362_v0, %v803_v9 }
 0x217   : > { %378 = vst [vmem:[%s242_s26 + $0x30] sm:$0xff] %v370_v1  ;;  %379 = vst [vmem:[%s242_s26 + $0x38] sm:$0xff] %v371_v2 }
 0x218   : > { %579 = shalt.err (!%p576_p2)
}
 0x219   : > { %s580_s9 = scalar_lea.hbm %s870_s14, 1024  ;;  %s584_s13 = scalar_lea.hbm %s921_s5, 2048 }
 0x21a   : > { %p581_p4 = scmp.ne.s32.totalorder %s870_s14, %s580_s9  ;;  %p585_p9 = scmp.lt.u32.totalorder %s870_s14, %s921_s5 }
 0x21b   : > { %p586_p1 = scmp.lt.u32.totalorder %s584_s13, %s580_s9  ;;  %p588_p6 = scmp.lt.u32.totalorder %s580_s9, %s870_s14 }
 0x21c   : > { %p582_p5 = pnand %p581_p4, %p928_p11 }
 0x21d   : > { %p587_p3 = por %p586_p1, %p585_p9 }
 0x21e   : > { %p583_p7 = pneg %p582_p5 }
 0x21f   : > { %p589_p12 = por %p588_p6, %p587_p3 }
 0x221   : > { %p590_p13 = pnand %p589_p12, %p583_p7 }
 0x223   : > { %593 = shalt.err (!%p590_p13)
}
 0x224   : > { %s639_s29 = smov 256   ;;  %s640_s25 = smov 16  }
 0x225   : > { %485 = dma.vmem_to_hbm [thread:$0]  (%p928_p11), %s865_s28, 1024, %s870_s14, %s381_s22, %s639_s29, %s639_s29, %s640_s25  }
 0x226 PF: > { %s409_s12 = sand.u32 1, %s620_s18   ;;  %p929_p8 = scmp.ne.s32.totalorder %s926_s6, 0 }
 0x227   : > { %p930_p10 = scmp.ge.s32.totalorder %s632_s21, 2  ;;  %s410_s15 = scalar_lea.sflag [#allocation4], %s409_s12 }
 0x229   : > { %p492_p0 = pnand %p930_p10, %p929_p8 }
 0x22b   : > { %615 = dma.done.wait (!%p492_p0), %s410_s15, 1024  }
 0x22c   : > { %617 = vsyncadd (!%p492_p0), %s410_s15, 4294966272  ;;  %p18_p2 = scmp.ge.s32.totalorder %s696_s24, 4   ;;  %s931_s18 = smov %s624_s19 }
 0x22d   : > { %s932_s19 = smov %s628_s20  ;;  %s933_s20 = smov %s708_s27 }
 0x22e   : > { %s934_s21 = smov %s696_s24  ;;  %20 = sbr.rel (!%p18_p2) target bundleno = 5 (0x5), region = 85 }
 0x235   :  { %415 = vsyncpa [#allocation3], 1 }
 0x236   :  { %417 = vsyncpa [#allocation3 + $0x1], 1 }
 0x237   :  { %418 = vsyncpa [#allocation4], 1 }
 0x238   :  { %420 = vsyncpa [#allocation4 + $0x1], 1 }

</bundles_post_ra>
